<compile_context>
chip_gen: v7x
topology: tpu7x:2x2x1
jax: 0.10.0
libtpu: 0.0.40
codegen_flags: <defaults>
</compile_context>

<pallas_src>
import math

import jax
import jax.numpy as jnp
from jax.experimental import pallas as pl
from jax.experimental.pallas import tpu as pltpu

# --- small Mistral-like config ---
HIDDEN = 32
NUM_HEADS = 4
NUM_KV_HEADS = 2
HEAD_DIM = HIDDEN // NUM_HEADS          # 8
KV_DIM = NUM_KV_HEADS * HEAD_DIM        # 16
N_REP = NUM_HEADS // NUM_KV_HEADS       # 2 (GQA repeat factor)
INTER = 64                              # intermediate_size
EPS = 1e-6                              # rms_norm_eps
ROPE_THETA = 10000.0
BATCH = 2
SEQ = 8
SCALE = 1.0 / math.sqrt(HEAD_DIM)
HALF = HEAD_DIM // 2
NEG_INF = -1e30

Q_PAD = NUM_HEADS * KV_DIM              # 64  : zero-padded q section width
SECT = 128                              # straight / rot sections padded to one lane-vreg
V_OFF = 2 * SECT                        # 256 : offset of v in fused projection
FUSED_W = V_OFF + KV_DIM                # 272 : total fused projection width


def _rms_norm(x, w):
    var = jnp.mean(x * x, axis=-1, keepdims=True)
    return x * jax.lax.rsqrt(var + EPS) * w


def decoder_layer_kernel(x_ref, wf_ref, woe_ref, wgu_ref, wd_ref,
                         ln1_ref, ln2_ref, cos_ref, sin_ref, out_ref):
    x = x_ref[...]                                   # [S, H] f32, one batch

    # ---- input RMSNorm (f32) ----
    h = _rms_norm(x, ln1_ref[...])

    # ---- ONE fused q/k/q_rot/k_rot/v projection (bf16 MXU, f32 accum) ----
    proj = jnp.dot(h.astype(jnp.bfloat16), wf_ref[...],
                   preferred_element_type=jnp.float32)               # [S, 272]

    # ---- RoPE: two vreg-aligned 128-lane slices, pure VPU math ----
    qk = proj[:, :SECT] * cos_ref[...] + proj[:, SECT:V_OFF] * sin_ref[...]
    v_slab = proj[:, V_OFF:V_OFF + KV_DIM].astype(jnp.bfloat16)      # [S, 16]

    # ---- ONE block-diagonal score matmul for all heads ----
    # q head groups were zero-padded to KV_DIM lanes wrapper-side; stacking the
    # NUM_HEADS groups on sublanes and contracting against the full [S, KV_DIM]
    # key slab picks the right kv head automatically (GQA fold in the weights).
    q_big = jnp.concatenate(
        [qk[:, g * KV_DIM:(g + 1) * KV_DIM] for g in range(NUM_HEADS)],
        axis=0).astype(jnp.bfloat16)                                 # [NH*S, 16]
    k_slab = qk[:, Q_PAD:Q_PAD + KV_DIM].astype(jnp.bfloat16)        # [S, 16]
    scores = jax.lax.dot_general(q_big, k_slab, (((1,), (1,)), ((), ())),
                                 preferred_element_type=jnp.float32)  # [NH*S, S]

    # ---- causal mask built in-kernel (no mask DMA) ----
    q_pos = jax.lax.broadcasted_iota(jnp.int32, scores.shape, 0) % SEQ
    k_pos = jax.lax.broadcasted_iota(jnp.int32, scores.shape, 1)
    scores = jnp.where(k_pos <= q_pos, scores, NEG_INF)

    # ---- single softmax chain for all heads (f32) ----
    m = jnp.max(scores, axis=-1, keepdims=True)
    e = jnp.exp(scores - m)
    denom = jnp.sum(e, axis=-1, keepdims=True)
    probs = (e * pl.reciprocal(denom, approx=True)).astype(jnp.bfloat16)

    # ---- ONE PV matmul for all heads / both kv groups; head->kv column
    #      selection is folded into the zero-expanded o_proj rows (no VMEM
    #      scratch, no masked sub-vreg stores) ----
    pv = jnp.dot(probs, v_slab,
                 preferred_element_type=jnp.float32).astype(jnp.bfloat16)  # [NH*S, 16]
    attn = None
    for hd in range(NUM_HEADS):
        part = jnp.dot(pv[hd * SEQ:(hd + 1) * SEQ, :],
                       woe_ref[hd * KV_DIM:(hd + 1) * KV_DIM, :],
                       preferred_element_type=jnp.float32)            # [S, H]
        attn = part if attn is None else attn + part

    h1 = x + attn                                     # first residual (f32)

    # ---- post-attention RMSNorm + fused SwiGLU MLP ----
    h2 = _rms_norm(h1, ln2_ref[...]).astype(jnp.bfloat16)
    gu = jnp.dot(h2, wgu_ref[...], preferred_element_type=jnp.float32)  # [S, 128]
    gate = gu[:, :INTER]
    up = gu[:, INTER:]
    act = (gate * jax.nn.sigmoid(gate) * up).astype(jnp.bfloat16)
    d = jnp.dot(act, wd_ref[...], preferred_element_type=jnp.float32)

    out_ref[...] = h1 + d                             # second residual


# ----------------------- wrapper-side (once per model) -----------------------
def _rotate_half_cols(w, n_heads):
    """Column permute+negate so that  x @ w_rot == rotate_half(x @ w)  per head."""
    w3 = w.reshape(w.shape[0], n_heads, HEAD_DIM)
    w1, w2 = w3[..., :HALF], w3[..., HALF:]
    return jnp.concatenate([-w2, w1], axis=-1).reshape(
        w.shape[0], n_heads * HEAD_DIM)


def _pad_q_heads(w):
    """[H, NH*HEAD_DIM] -> [H, NH*KV_DIM]: each q head's 8 columns placed at its
    kv head's offset inside a KV_DIM-wide zero group (GQA fold in weights)."""
    blocks = []
    for hd in range(NUM_HEADS):
        kv = hd // N_REP
        blk = jnp.zeros((w.shape[0], KV_DIM), w.dtype)
        blk = blk.at[:, kv * HEAD_DIM:(kv + 1) * HEAD_DIM].set(
            w[:, hd * HEAD_DIM:(hd + 1) * HEAD_DIM])
        blocks.append(blk)
    return jnp.concatenate(blocks, axis=1)


def prepare_layer(params, cos_h, sin_h):
    """Fold weights / RoPE tables ONCE per model (hoisted out of the hot path)."""
    wq, wk, wv, wo = params['wq'], params['wk'], params['wv'], params['wo']

    zpad = jnp.zeros((HIDDEN, SECT - Q_PAD - KV_DIM), jnp.float32)     # [32, 48]
    straight = jnp.concatenate([_pad_q_heads(wq), wk, zpad], axis=1)   # [32, 128]
    rot = jnp.concatenate([_pad_q_heads(_rotate_half_cols(wq, NUM_HEADS)),
                           _rotate_half_cols(wk, NUM_KV_HEADS), zpad], axis=1)
    w_fused = jnp.concatenate([straight, rot, wv], axis=1).astype(jnp.bfloat16)

    # o_proj rows expanded per head: wo rows of head h placed at its kv head's
    # row offset inside a KV_DIM-tall zero block -> PV column selection is free.
    blocks = []
    for hd in range(NUM_HEADS):
        kv = hd // N_REP
        blk = jnp.zeros((KV_DIM, HIDDEN), jnp.float32)
        blk = blk.at[kv * HEAD_DIM:(kv + 1) * HEAD_DIM, :].set(
            wo[hd * HEAD_DIM:(hd + 1) * HEAD_DIM, :])
        blocks.append(blk)
    wo_exp = jnp.concatenate(blocks, axis=0).astype(jnp.bfloat16)      # [64, 32]

    w_gu = jnp.concatenate([params['wg'], params['wu']], axis=1).astype(jnp.bfloat16)
    w_d = params['wd'].astype(jnp.bfloat16)

    # RoPE tables: one 128-lane vreg each; 1/sqrt(head_dim) folded into q cols.
    cos_full = jnp.concatenate([cos_h, cos_h], axis=-1)                # [S, HEAD_DIM]
    sin_full = jnp.concatenate([sin_h, sin_h], axis=-1)
    zt = jnp.zeros((SEQ, SECT - Q_PAD - KV_DIM), jnp.float32)
    cos128 = jnp.concatenate([jnp.tile(cos_full, (1, Q_PAD // HEAD_DIM)) * SCALE,
                              jnp.tile(cos_full, (1, NUM_KV_HEADS)), zt], axis=1)
    sin128 = jnp.concatenate([jnp.tile(sin_full, (1, Q_PAD // HEAD_DIM)) * SCALE,
                              jnp.tile(sin_full, (1, NUM_KV_HEADS)), zt], axis=1)

    return dict(wf=w_fused, woe=wo_exp, wgu=w_gu, wd=w_d,
                ln1=params['ln1'], ln2=params['ln2'],
                cos=cos128, sin=sin128)


def mistral_decoder_layer(x, prep):
    B, S, H = x.shape
    x2 = x.reshape(B * S, H)
    args = (x2, prep['wf'], prep['woe'], prep['wgu'], prep['wd'],
            prep['ln1'], prep['ln2'], prep['cos'], prep['sin'])
    in_specs = ([pl.BlockSpec((S, H), lambda b: (b, 0))] +
                [pl.BlockSpec(a.shape, lambda b: (0, 0)) for a in args[1:]])
    # TODO(synk): when stacking N decoder layers, add a leading grid axis over
    # layers with weight index_maps so weight DMA pipelines across layers.
    out2 = pl.pallas_call(
        decoder_layer_kernel,
        out_shape=jax.ShapeDtypeStruct((B * S, H), jnp.float32),
        grid_spec=pltpu.PrefetchScalarGridSpec(
            num_scalar_prefetch=0,
            grid=(B,),                      # one batch per step; 2 TCs on v7x
            in_specs=in_specs,
            out_specs=pl.BlockSpec((S, H), lambda b: (b, 0))),
        compiler_params=pltpu.CompilerParams(
            dimension_semantics=("parallel",)),
    )(*args)
    return out2.reshape(B, S, H)


# ---------------- pure-JAX reference (HF Mistral semantics) ----------------
def _rotate_half(x):
    x1, x2 = x[..., :x.shape[-1] // 2], x[..., x.shape[-1] // 2:]
    return jnp.concatenate([-x2, x1], axis=-1)


def reference(x, p, cos_h, sin_h):
    cos = jnp.concatenate([cos_h, cos_h], axis=-1)     # [S, DH]
    sin = jnp.concatenate([sin_h, sin_h], axis=-1)
    B, S, H = x.shape

    def rms(v, w):
        var = jnp.mean(v * v, axis=-1, keepdims=True)
        return v * jax.lax.rsqrt(var + EPS) * w

    residual = x
    h = rms(x, p['ln1'])
    q = (h @ p['wq']).reshape(B, S, NUM_HEADS, HEAD_DIM).transpose(0, 2, 1, 3)
    k = (h @ p['wk']).reshape(B, S, NUM_KV_HEADS, HEAD_DIM).transpose(0, 2, 1, 3)
    v = (h @ p['wv']).reshape(B, S, NUM_KV_HEADS, HEAD_DIM).transpose(0, 2, 1, 3)
    q = q * cos[None, None] + _rotate_half(q) * sin[None, None]
    k = k * cos[None, None] + _rotate_half(k) * sin[None, None]
    k = jnp.repeat(k, N_REP, axis=1)
    v = jnp.repeat(v, N_REP, axis=1)
    scores = jnp.einsum('bhqd,bhkd->bhqk', q, k) * SCALE
    causal = jnp.tril(jnp.ones((S, S), bool))
    scores = jnp.where(causal[None, None], scores, -1e30)
    attn = jax.nn.softmax(scores, axis=-1)
    o = jnp.einsum('bhqk,bhkd->bhqd', attn, v).transpose(0, 2, 1, 3).reshape(B, S, H)
    h = residual + o @ p['wo']
    residual = h
    h2 = rms(h, p['ln2'])
    mlp = (jax.nn.silu(h2 @ p['wg']) * (h2 @ p['wu'])) @ p['wd']
    return residual + mlp


if __name__ == "__main__":
    key = jax.random.PRNGKey(0)
    keys = jax.random.split(key, 8)
    scale = 0.05
    params = {
        'wq': scale * jax.random.normal(keys[0], (HIDDEN, HIDDEN), jnp.float32),
        'wk': scale * jax.random.normal(keys[1], (HIDDEN, KV_DIM), jnp.float32),
        'wv': scale * jax.random.normal(keys[2], (HIDDEN, KV_DIM), jnp.float32),
        'wo': scale * jax.random.normal(keys[3], (HIDDEN, HIDDEN), jnp.float32),
        'wg': scale * jax.random.normal(keys[4], (HIDDEN, INTER), jnp.float32),
        'wu': scale * jax.random.normal(keys[5], (HIDDEN, INTER), jnp.float32),
        'wd': scale * jax.random.normal(keys[6], (INTER, HIDDEN), jnp.float32),
        'ln1': jnp.ones((1, HIDDEN), jnp.float32),
        'ln2': jnp.ones((1, HIDDEN), jnp.float32),
    }
    x = jax.random.normal(keys[7], (BATCH, SEQ, HIDDEN), jnp.float32)

    # RoPE half-tables (position_ids = arange(SEQ)).
    pos = jnp.arange(SEQ, dtype=jnp.float32)
    inv_freq = 1.0 / (ROPE_THETA ** (jnp.arange(0, HEAD_DIM, 2, dtype=jnp.float32)
                                     / HEAD_DIM))
    freqs = pos[:, None] * inv_freq[None, :]           # [S, HEAD_DIM//2]
    cos_h = jnp.cos(freqs)
    sin_h = jnp.sin(freqs)

    prep = prepare_layer(params, cos_h, sin_h)          # once per model
    layer = jax.jit(mistral_decoder_layer)

    out = layer(x, prep)
    out = jax.block_until_ready(out)

    ref = reference(x, params, cos_h, sin_h)
    assert out.shape == (BATCH, SEQ, HIDDEN)
    # bf16 MXU operands (per perf review) -> tolerance loosened vs pure-f32.
    assert jnp.allclose(out, ref, atol=1e-2, rtol=1e-2), (
        f"max err {jnp.max(jnp.abs(out - ref))}")
    print("KERNEL_OK")
</pallas_src>

<mosaic_0001>
module attributes {stable_mosaic.version = 11 : i64} {
  func.func @decoder_layer_kernel(%arg0: i32, %arg1: memref<8x32xf32, #tpu.memory_space<vmem>>, %arg2: memref<32x272xbf16, #tpu.memory_space<vmem>>, %arg3: memref<64x32xbf16, #tpu.memory_space<vmem>>, %arg4: memref<32x128xbf16, #tpu.memory_space<vmem>>, %arg5: memref<64x32xbf16, #tpu.memory_space<vmem>>, %arg6: memref<1x32xf32, #tpu.memory_space<vmem>>, %arg7: memref<1x32xf32, #tpu.memory_space<vmem>>, %arg8: memref<8x128xf32, #tpu.memory_space<vmem>>, %arg9: memref<8x128xf32, #tpu.memory_space<vmem>>, %arg10: memref<8x32xf32, #tpu.memory_space<vmem>>) attributes {dimension_semantics = [#tpu.dimension_semantics<parallel>], iteration_bounds = array<i64: 2>, scalar_prefetch = 0 : i64, scratch_operands = 0 : i64, tpu.core_type = #tpu.core_type<tc>, window_params = [{transform_indices = @transform_0, window_bounds = array<i64: 8, 32>}, {pipeline_mode = #tpu.pipeline_mode<synchronous>, transform_indices = @transform_1, window_bounds = array<i64: 32, 272>}, {pipeline_mode = #tpu.pipeline_mode<synchronous>, transform_indices = @transform_2, window_bounds = array<i64: 64, 32>}, {pipeline_mode = #tpu.pipeline_mode<synchronous>, transform_indices = @transform_3, window_bounds = array<i64: 32, 128>}, {pipeline_mode = #tpu.pipeline_mode<synchronous>, transform_indices = @transform_4, window_bounds = array<i64: 64, 32>}, {pipeline_mode = #tpu.pipeline_mode<synchronous>, transform_indices = @transform_5, window_bounds = array<i64: 1, 32>}, {pipeline_mode = #tpu.pipeline_mode<synchronous>, transform_indices = @transform_6, window_bounds = array<i64: 1, 32>}, {pipeline_mode = #tpu.pipeline_mode<synchronous>, transform_indices = @transform_7, window_bounds = array<i64: 8, 128>}, {pipeline_mode = #tpu.pipeline_mode<synchronous>, transform_indices = @transform_8, window_bounds = array<i64: 8, 128>}, {transform_indices = @transform_9, window_bounds = array<i64: 8, 32>}]} {
    %c0 = arith.constant 0 : index
    %c0_0 = arith.constant 0 : index
    %0 = vector.load %arg1[%c0, %c0_0] : memref<8x32xf32, #tpu.memory_space<vmem>>, vector<8x32xf32>
    %c0_1 = arith.constant 0 : index
    %c0_2 = arith.constant 0 : index
    %1 = vector.load %arg6[%c0_1, %c0_2] : memref<1x32xf32, #tpu.memory_space<vmem>>, vector<1x32xf32>
    %2 = arith.mulf %0, %0 : vector<8x32xf32>
    %cst = arith.constant dense<0.000000e+00> : vector<8xf32>
    %3 = vector.multi_reduction <add>, %2, %cst [1] : vector<8x32xf32> to vector<8xf32>
    %4 = vector.shape_cast %3 : vector<8xf32> to vector<8x1xf32>
    %cst_3 = arith.constant 3.200000e+01 : f32
    %5 = vector.broadcast %cst_3 : f32 to vector<8x1xf32>
    %6 = arith.divf %4, %5 : vector<8x1xf32>
    %cst_4 = arith.constant 9.99999997E-7 : f32
    %7 = vector.broadcast %cst_4 : f32 to vector<8x1xf32>
    %8 = arith.addf %6, %7 : vector<8x1xf32>
    %9 = math.rsqrt %8 : vector<8x1xf32>
    %10 = vector.broadcast %9 : vector<8x1xf32> to vector<8x32xf32>
    %11 = arith.mulf %0, %10 : vector<8x32xf32>
    %12 = vector.broadcast %1 : vector<1x32xf32> to vector<8x32xf32>
    %13 = arith.mulf %11, %12 : vector<8x32xf32>
    %14 = arith.truncf %13 : vector<8x32xf32> to vector<8x32xbf16>
    %c0_5 = arith.constant 0 : index
    %c0_6 = arith.constant 0 : index
    %15 = vector.load %arg2[%c0_5, %c0_6] : memref<32x272xbf16, #tpu.memory_space<vmem>>, vector<32x272xbf16>
    %cst_7 = arith.constant dense<0.000000e+00> : vector<8x272xf32>
    %16 = tpu.matmul %14, %15, %cst_7 {dimension_numbers = #tpu.dot_dimension_numbers<[1], [0], [0], [1], [0, 0, 1, 1], [], []>} : vector<8x32xbf16>, vector<32x272xbf16>, vector<8x272xf32> -> vector<8x272xf32>
    %17 = vector.extract_strided_slice %16 {offsets = [0, 0], sizes = [8, 128], strides = [1, 1]} : vector<8x272xf32> to vector<8x128xf32>
    %c0_8 = arith.constant 0 : index
    %c0_9 = arith.constant 0 : index
    %18 = vector.load %arg8[%c0_8, %c0_9] : memref<8x128xf32, #tpu.memory_space<vmem>>, vector<8x128xf32>
    %19 = arith.mulf %17, %18 : vector<8x128xf32>
    %20 = vector.extract_strided_slice %16 {offsets = [0, 128], sizes = [8, 128], strides = [1, 1]} : vector<8x272xf32> to vector<8x128xf32>
    %c0_10 = arith.constant 0 : index
    %c0_11 = arith.constant 0 : index
    %21 = vector.load %arg9[%c0_10, %c0_11] : memref<8x128xf32, #tpu.memory_space<vmem>>, vector<8x128xf32>
    %22 = arith.mulf %20, %21 : vector<8x128xf32>
    %23 = arith.addf %19, %22 : vector<8x128xf32>
    %24 = vector.extract_strided_slice %16 {offsets = [0, 256], sizes = [8, 16], strides = [1, 1]} : vector<8x272xf32> to vector<8x16xf32>
    %25 = arith.truncf %24 : vector<8x16xf32> to vector<8x16xbf16>
    %26 = vector.extract_strided_slice %23 {offsets = [0, 0], sizes = [8, 16], strides = [1, 1]} : vector<8x128xf32> to vector<8x16xf32>
    %27 = vector.extract_strided_slice %23 {offsets = [0, 16], sizes = [8, 16], strides = [1, 1]} : vector<8x128xf32> to vector<8x16xf32>
    %28 = vector.extract_strided_slice %23 {offsets = [0, 32], sizes = [8, 16], strides = [1, 1]} : vector<8x128xf32> to vector<8x16xf32>
    %29 = vector.extract_strided_slice %23 {offsets = [0, 48], sizes = [8, 16], strides = [1, 1]} : vector<8x128xf32> to vector<8x16xf32>
    %30 = tpu.concatenate %26, %27, %28, %29 in 0 : vector<8x16xf32>, vector<8x16xf32>, vector<8x16xf32>, vector<8x16xf32> -> vector<32x16xf32>
    %31 = arith.truncf %30 : vector<32x16xf32> to vector<32x16xbf16>
    %32 = vector.extract_strided_slice %23 {offsets = [0, 64], sizes = [8, 16], strides = [1, 1]} : vector<8x128xf32> to vector<8x16xf32>
    %33 = arith.truncf %32 : vector<8x16xf32> to vector<8x16xbf16>
    %cst_12 = arith.constant dense<0.000000e+00> : vector<32x8xf32>
    %34 = tpu.matmul %31, %33, %cst_12 {dimension_numbers = #tpu.dot_dimension_numbers<[1], [1], [0], [0], [0, 0, 1, 0], [], []>} : vector<32x16xbf16>, vector<8x16xbf16>, vector<32x8xf32> -> vector<32x8xf32>
    %35 = tpu.iota {dimensions = array<i32: 0>} : vector<32x8xi32>
    %c8_i32 = arith.constant 8 : i32
    %c0_i32 = arith.constant 0 : i32
    %36 = arith.cmpi eq, %c8_i32, %c0_i32 : i32
    %c1_i32 = arith.constant 1 : i32
    %37 = arith.select %36, %c1_i32, %c8_i32 : i32
    %38 = vector.broadcast %37 : i32 to vector<32x8xi32>
    %39 = arith.remsi %35, %38 : vector<32x8xi32>
    %c0_i32_13 = arith.constant 0 : i32
    %40 = vector.broadcast %c0_i32_13 : i32 to vector<32x8xi32>
    %41 = arith.cmpi ne, %39, %40 : vector<32x8xi32>
    %c0_i32_14 = arith.constant 0 : i32
    %42 = vector.broadcast %c0_i32_14 : i32 to vector<32x8xi32>
    %43 = arith.cmpi slt, %39, %42 : vector<32x8xi32>
    %c0_i32_15 = arith.constant 0 : i32
    %44 = arith.cmpi slt, %37, %c0_i32_15 : i32
    %45 = vector.broadcast %44 : i1 to vector<32x8xi1>
    %46 = vector.broadcast %45 : vector<32x8xi1> to vector<32x8xi1>
    %47 = arith.xori %43, %46 : vector<32x8xi1>
    %48 = arith.andi %47, %41 : vector<32x8xi1>
    %49 = vector.broadcast %37 : i32 to vector<32x8xi32>
    %50 = arith.addi %39, %49 : vector<32x8xi32>
    %51 = arith.select %48, %50, %39 : vector<32x8xi1>, vector<32x8xi32>
    %52 = tpu.iota {dimensions = array<i32: 1>} : vector<32x8xi32>
    %53 = arith.cmpi sle, %52, %51 : vector<32x8xi32>
    %cst_16 = arith.constant -1.000000e+30 : f32
    %54 = vector.broadcast %cst_16 : f32 to vector<32x8xf32>
    %55 = arith.select %53, %34, %54 : vector<32x8xi1>, vector<32x8xf32>
    %cst_17 = arith.constant dense<0xFF800000> : vector<32xf32>
    %56 = vector.multi_reduction <maximumf>, %55, %cst_17 [1] : vector<32x8xf32> to vector<32xf32>
    %57 = vector.shape_cast %56 : vector<32xf32> to vector<32x1xf32>
    %58 = vector.broadcast %57 : vector<32x1xf32> to vector<32x8xf32>
    %59 = arith.subf %55, %58 : vector<32x8xf32>
    %60 = math.exp %59 : vector<32x8xf32>
    %cst_18 = arith.constant dense<0.000000e+00> : vector<32xf32>
    %61 = vector.multi_reduction <add>, %60, %cst_18 [1] : vector<32x8xf32> to vector<32xf32>
    %62 = vector.shape_cast %61 : vector<32xf32> to vector<32x1xf32>
    %63 = tpu.reciprocal %62 {approx = true} : vector<32x1xf32> -> vector<32x1xf32>
    %64 = vector.broadcast %63 : vector<32x1xf32> to vector<32x8xf32>
    %65 = arith.mulf %60, %64 : vector<32x8xf32>
    %66 = arith.truncf %65 : vector<32x8xf32> to vector<32x8xbf16>
    %cst_19 = arith.constant dense<0.000000e+00> : vector<32x16xf32>
    %67 = tpu.matmul %66, %25, %cst_19 {dimension_numbers = #tpu.dot_dimension_numbers<[1], [0], [0], [1], [0, 0, 1, 1], [], []>} : vector<32x8xbf16>, vector<8x16xbf16>, vector<32x16xf32> -> vector<32x16xf32>
    %68 = arith.truncf %67 : vector<32x16xf32> to vector<32x16xbf16>
    %69 = vector.extract_strided_slice %68 {offsets = [0, 0], sizes = [8, 16], strides = [1, 1]} : vector<32x16xbf16> to vector<8x16xbf16>
    %c0_20 = arith.constant 0 : index
    %c0_21 = arith.constant 0 : index
    %70 = vector.load %arg3[%c0_20, %c0_21] : memref<64x32xbf16, #tpu.memory_space<vmem>>, vector<16x32xbf16>
    %cst_22 = arith.constant dense<0.000000e+00> : vector<8x32xf32>
    %71 = tpu.matmul %69, %70, %cst_22 {dimension_numbers = #tpu.dot_dimension_numbers<[1], [0], [0], [1], [0, 0, 1, 1], [], []>} : vector<8x16xbf16>, vector<16x32xbf16>, vector<8x32xf32> -> vector<8x32xf32>
    %72 = vector.extract_strided_slice %68 {offsets = [8, 0], sizes = [8, 16], strides = [1, 1]} : vector<32x16xbf16> to vector<8x16xbf16>
    %c16 = arith.constant 16 : index
    %c0_23 = arith.constant 0 : index
    %73 = vector.load %arg3[%c16, %c0_23] : memref<64x32xbf16, #tpu.memory_space<vmem>>, vector<16x32xbf16>
    %cst_24 = arith.constant dense<0.000000e+00> : vector<8x32xf32>
    %74 = tpu.matmul %72, %73, %cst_24 {dimension_numbers = #tpu.dot_dimension_numbers<[1], [0], [0], [1], [0, 0, 1, 1], [], []>} : vector<8x16xbf16>, vector<16x32xbf16>, vector<8x32xf32> -> vector<8x32xf32>
    %75 = arith.addf %71, %74 : vector<8x32xf32>
    %76 = vector.extract_strided_slice %68 {offsets = [16, 0], sizes = [8, 16], strides = [1, 1]} : vector<32x16xbf16> to vector<8x16xbf16>
    %c32 = arith.constant 32 : index
    %c0_25 = arith.constant 0 : index
    %77 = vector.load %arg3[%c32, %c0_25] : memref<64x32xbf16, #tpu.memory_space<vmem>>, vector<16x32xbf16>
    %cst_26 = arith.constant dense<0.000000e+00> : vector<8x32xf32>
    %78 = tpu.matmul %76, %77, %cst_26 {dimension_numbers = #tpu.dot_dimension_numbers<[1], [0], [0], [1], [0, 0, 1, 1], [], []>} : vector<8x16xbf16>, vector<16x32xbf16>, vector<8x32xf32> -> vector<8x32xf32>
    %79 = arith.addf %75, %78 : vector<8x32xf32>
    %80 = vector.extract_strided_slice %68 {offsets = [24, 0], sizes = [8, 16], strides = [1, 1]} : vector<32x16xbf16> to vector<8x16xbf16>
    %c48 = arith.constant 48 : index
    %c0_27 = arith.constant 0 : index
    %81 = vector.load %arg3[%c48, %c0_27] : memref<64x32xbf16, #tpu.memory_space<vmem>>, vector<16x32xbf16>
    %cst_28 = arith.constant dense<0.000000e+00> : vector<8x32xf32>
    %82 = tpu.matmul %80, %81, %cst_28 {dimension_numbers = #tpu.dot_dimension_numbers<[1], [0], [0], [1], [0, 0, 1, 1], [], []>} : vector<8x16xbf16>, vector<16x32xbf16>, vector<8x32xf32> -> vector<8x32xf32>
    %83 = arith.addf %79, %82 : vector<8x32xf32>
    %84 = arith.addf %0, %83 : vector<8x32xf32>
    %c0_29 = arith.constant 0 : index
    %c0_30 = arith.constant 0 : index
    %85 = vector.load %arg7[%c0_29, %c0_30] : memref<1x32xf32, #tpu.memory_space<vmem>>, vector<1x32xf32>
    %86 = arith.mulf %84, %84 : vector<8x32xf32>
    %cst_31 = arith.constant dense<0.000000e+00> : vector<8xf32>
    %87 = vector.multi_reduction <add>, %86, %cst_31 [1] : vector<8x32xf32> to vector<8xf32>
    %88 = vector.shape_cast %87 : vector<8xf32> to vector<8x1xf32>
    %cst_32 = arith.constant 3.200000e+01 : f32
    %89 = vector.broadcast %cst_32 : f32 to vector<8x1xf32>
    %90 = arith.divf %88, %89 : vector<8x1xf32>
    %cst_33 = arith.constant 9.99999997E-7 : f32
    %91 = vector.broadcast %cst_33 : f32 to vector<8x1xf32>
    %92 = arith.addf %90, %91 : vector<8x1xf32>
    %93 = math.rsqrt %92 : vector<8x1xf32>
    %94 = vector.broadcast %93 : vector<8x1xf32> to vector<8x32xf32>
    %95 = arith.mulf %84, %94 : vector<8x32xf32>
    %96 = vector.broadcast %85 : vector<1x32xf32> to vector<8x32xf32>
    %97 = arith.mulf %95, %96 : vector<8x32xf32>
    %98 = arith.truncf %97 : vector<8x32xf32> to vector<8x32xbf16>
    %c0_34 = arith.constant 0 : index
    %c0_35 = arith.constant 0 : index
    %99 = vector.load %arg4[%c0_34, %c0_35] : memref<32x128xbf16, #tpu.memory_space<vmem>>, vector<32x128xbf16>
    %cst_36 = arith.constant dense<0.000000e+00> : vector<8x128xf32>
    %100 = tpu.matmul %98, %99, %cst_36 {dimension_numbers = #tpu.dot_dimension_numbers<[1], [0], [0], [1], [0, 0, 1, 1], [], []>} : vector<8x32xbf16>, vector<32x128xbf16>, vector<8x128xf32> -> vector<8x128xf32>
    %101 = vector.extract_strided_slice %100 {offsets = [0, 0], sizes = [8, 64], strides = [1, 1]} : vector<8x128xf32> to vector<8x64xf32>
    %102 = vector.extract_strided_slice %100 {offsets = [0, 64], sizes = [8, 64], strides = [1, 1]} : vector<8x128xf32> to vector<8x64xf32>
    %103 = arith.negf %101 : vector<8x64xf32>
    %104 = math.exp %103 : vector<8x64xf32>
    %cst_37 = arith.constant 1.000000e+00 : f32
    %105 = vector.broadcast %cst_37 : f32 to vector<8x64xf32>
    %106 = arith.addf %105, %104 : vector<8x64xf32>
    %107 = arith.divf %105, %106 : vector<8x64xf32>
    %108 = arith.mulf %101, %107 : vector<8x64xf32>
    %109 = arith.mulf %108, %102 : vector<8x64xf32>
    %110 = arith.truncf %109 : vector<8x64xf32> to vector<8x64xbf16>
    %c0_38 = arith.constant 0 : index
    %c0_39 = arith.constant 0 : index
    %111 = vector.load %arg5[%c0_38, %c0_39] : memref<64x32xbf16, #tpu.memory_space<vmem>>, vector<64x32xbf16>
    %cst_40 = arith.constant dense<0.000000e+00> : vector<8x32xf32>
    %112 = tpu.matmul %110, %111, %cst_40 {dimension_numbers = #tpu.dot_dimension_numbers<[1], [0], [0], [1], [0, 0, 1, 1], [], []>} : vector<8x64xbf16>, vector<64x32xbf16>, vector<8x32xf32> -> vector<8x32xf32>
    %113 = arith.addf %84, %112 : vector<8x32xf32>
    %c0_41 = arith.constant 0 : index
    %c0_42 = arith.constant 0 : index
    %114 = vector.load %arg10[%c0_41, %c0_42] : memref<8x32xf32, #tpu.memory_space<vmem>>, vector<8x32xf32>
    tpu.vector_store %arg10[%c0_41, %c0_42], %113 {strides = array<i32>} : memref<8x32xf32, #tpu.memory_space<vmem>>, vector<8x32xf32>,
    return
  }
  func.func @transform_0(%arg0: i32) -> (i32, i32) {
    %c0_i32 = arith.constant 0 : i32
    %c0_i32_0 = arith.constant 0 : i32
    return %arg0, %c0_i32 : i32, i32
  }
  func.func @transform_1(%arg0: i32) -> (i32, i32) {
    %c0_i32 = arith.constant 0 : i32
    %c0_i32_0 = arith.constant 0 : i32
    %c0_i32_1 = arith.constant 0 : i32
    return %c0_i32, %c0_i32_0 : i32, i32
  }
  func.func @transform_2(%arg0: i32) -> (i32, i32) {
    %c0_i32 = arith.constant 0 : i32
    %c0_i32_0 = arith.constant 0 : i32
    %c0_i32_1 = arith.constant 0 : i32
    return %c0_i32, %c0_i32_0 : i32, i32
  }
  func.func @transform_3(%arg0: i32) -> (i32, i32) {
    %c0_i32 = arith.constant 0 : i32
    %c0_i32_0 = arith.constant 0 : i32
    %c0_i32_1 = arith.constant 0 : i32
    return %c0_i32, %c0_i32_0 : i32, i32
  }
  func.func @transform_4(%arg0: i32) -> (i32, i32) {
    %c0_i32 = arith.constant 0 : i32
    %c0_i32_0 = arith.constant 0 : i32
    %c0_i32_1 = arith.constant 0 : i32
    return %c0_i32, %c0_i32_0 : i32, i32
  }
  func.func @transform_5(%arg0: i32) -> (i32, i32) {
    %c0_i32 = arith.constant 0 : i32
    %c0_i32_0 = arith.constant 0 : i32
    %c0_i32_1 = arith.constant 0 : i32
    return %c0_i32, %c0_i32_0 : i32, i32
  }
  func.func @transform_6(%arg0: i32) -> (i32, i32) {
    %c0_i32 = arith.constant 0 : i32
    %c0_i32_0 = arith.constant 0 : i32
    %c0_i32_1 = arith.constant 0 : i32
    return %c0_i32, %c0_i32_0 : i32, i32
  }
  func.func @transform_7(%arg0: i32) -> (i32, i32) {
    %c0_i32 = arith.constant 0 : i32
    %c0_i32_0 = arith.constant 0 : i32
    %c0_i32_1 = arith.constant 0 : i32
    return %c0_i32, %c0_i32_0 : i32, i32
  }
  func.func @transform_8(%arg0: i32) -> (i32, i32) {
    %c0_i32 = arith.constant 0 : i32
    %c0_i32_0 = arith.constant 0 : i32
    %c0_i32_1 = arith.constant 0 : i32
    return %c0_i32, %c0_i32_0 : i32, i32
  }
  func.func @transform_9(%arg0: i32) -> (i32, i32) {
    %c0_i32 = arith.constant 0 : i32
    %c0_i32_0 = arith.constant 0 : i32
    return %arg0, %c0_i32 : i32, i32
  }
}

</mosaic_0001>

<bundles_post_ra>
// kernel: mistral_decoder_layer.1
= control target key start
LH: loop header
LB: loop body
LE: loop exit
PB: predicated region body
PF: predicated region fallthrough
CT: control target
= control target key end

     0   :  { %14 = vsyncpa [#allocation3], 0  ;;  %s1941_s0 = inlined_call_operand.vmem [shape: f32[16,32], index: 0, kind: input, shape index: {}]   ;;  %s1942_s1 = inlined_call_operand.vmem [shape: bf16[32,272], index: 1, kind: input, shape index: {}]   ;;  %s1943_s2 = inlined_call_operand.vmem [shape: bf16[64,32], index: 2, kind: input, shape index: {}]   ;;  %s1944_s3 = inlined_call_operand.vmem [shape: bf16[32,128], index: 3, kind: input, shape index: {}]   ;;  %s1945_s4 = inlined_call_operand.vmem [shape: bf16[64,32], index: 4, kind: input, shape index: {}]   ;;  %s1946_s5 = inlined_call_operand.vmem [shape: f32[1,32], index: 5, kind: input, shape index: {}]   ;;  %s1947_s6 = inlined_call_operand.vmem [shape: f32[1,32], index: 6, kind: input, shape index: {}]   ;;  %s1948_s7 = inlined_call_operand.hbm [shape: f32[8,128], index: 7, kind: input, shape index: {}]   ;;  %s1949_s8 = inlined_call_operand.hbm [shape: f32[8,128], index: 8, kind: input, shape index: {}]   ;;  %s1950_s9 = inlined_call_operand.hbm [shape: f32[16,32], index: 9, kind: output, shape index: {}]  }
   0x1   :  { %15 = vsyncpa [#allocation6], 0 }
   0x2   :  { %16 = vsyncpa [#allocation4], 0 }
   0x3   :  { %18 = vsyncpa [#allocation4 + $0x1], 0  ;;  %s1657_s30 = smov 0   ;;  %s1659_s10 = smov 0  }
   0x4   :  { %s1661_s11 = smov 0   ;;  %s1663_s12 = smov 0  }
   0x5 LB: > { %s1678_s13 = sadd.s32 4294967295, %s1595_s12   ;;  %s1224_s14 = sadd.s32 4294967294, %s1595_s12   ;;  %s1595_s12 = sphi %s1663_s12, %s1970_s12   ;;  %s1591_s11 = sphi %s1661_s11, %s1969_s11   ;;  %s1587_s10 = sphi %s1659_s10, %s1968_s10   ;;  %s1583_s30 = sphi %s1657_s30, %s1967_s30  }
   0x6   : > { %s1682_s15 = sadd.s32 1, %s1595_s12   ;;  %s225_s16 = sadd.s32 1, %s1591_s11 }
   0x7   : > { %s222_s17 = ssub.s32 %s1595_s12, %s1682_s15  ;;  %p235_p0 = scmp.ne.s32.totalorder %s1591_s11, %s1587_s10 }
   0x8   : > { %p223_p1 = scmp.eq.s32.totalorder %s222_s17, 0  ;;  %p236_p2 = scmp.eq.s32.totalorder %s1678_s13, 1 }
   0x9   : > { %p241_p3 = scmp.ne.s32.totalorder %s1587_s10, %s1583_s30  ;;  %p242_p4 = scmp.eq.s32.totalorder %s1224_s14, 1 }
   0xa   : > { %s1693_s18 = scalar_select %p223_p1, %s1591_s11, %s225_s16  }
   0xb   : > { %p1695_p5 = por %p236_p2, %p235_p0  ;;  %p1699_p6 = por %p242_p4, %p241_p3 }
   0xc   : > { %1954 = sst [smem:[#allocation11_spill]] %s1693_s18  ;;  %p1225_p7 = scmp.ge.s32.totalorder %s1595_s12, 1 }
   0xd   : > { %s1955_s19 = scalar_select %p1695_p5, 1, 0 }
   0xe   : > { %s1956_s20 = scalar_select %p1699_p6, 1, 0 }
   0xf   : > { %p249_p8 = scmp.lt.s32.totalorder %s1595_s12, 3  ;;  %p1951_p9 = scmp.eq.s32.totalorder %s1678_s13, 0 }
  0x10   : > { %s1597_s22 = smov [#allocation2]   ;;  %s1598_s24 = smov [#allocation5]  }
  0x11   : > { %p1706_p10 = pnand %p1225_p7, %p249_p8  ;;  %s280_s23 = sshll.u32 %s1597_s22, 4  ;;  %s281_s23 = int_to_ptr.vmem [resolvable:$true] %s280_s23 }
  0x12   : > { %s291_s25 = sshll.u32 %s1598_s24, 4  ;;  %s1469_s29 = scalar_lea.hbm %s1948_s7, 128  ;;  %s1718_s25 = int_to_ptr.vmem [resolvable:$true] %s291_s25 }
  0x13   : > { %s1957_s21 = scalar_select %p1706_p10, 1, 0 }
  0x14   : > { %p1370_p11 = pneg %p1706_p10  ;;  %p1470_p13 = scmp.ne.s32.totalorder %s1948_s7, %s1469_s29 }
  0x15   : > { %p1476_p3 = scmp.lt.u32.totalorder %s1469_s29, %s1948_s7 }
  0x16   : > { %p1714_p12 = pnand %p1951_p9, %p1370_p11 }
  0x18   : > { %p1471_p0 = pneg %p1714_p12 }
  0x1a   : > { %p1472_p1 = pnand %p1471_p0, %p1470_p13 }
  0x1c   : > { %p1473_p2 = pneg %p1472_p1 }
  0x1e   : > { %p1478_p4 = pnand %p1476_p3, %p1473_p2 }
  0x20   : > { %1481 = shalt.err (!%p1478_p4)
}
  0x21   : > { %s1482_s24 = scalar_lea.vmem %s281_s23, 128  ;;  %p1490_p9 = scmp.lt.s32.totalorder %s281_s23, %s281_s23 }
  0x22   : > { %p1483_p7 = scmp.ne.s32.totalorder %s281_s23, %s1482_s24  ;;  %p1491_p6 = scmp.lt.s32.totalorder %s1482_s24, %s1482_s24 }
  0x24   : > { %p1485_p8 = pnand %p1483_p7, %p1471_p0  ;;  %p1492_p5 = por %p1491_p6, %p1490_p9 }
  0x26   : > { %p1486_p11 = pneg %p1485_p8 }
  0x28   : > { %p1493_p10 = pnand %p1492_p5, %p1486_p11 }
  0x2a   : > { %1496 = shalt.err (!%p1493_p10)
}
  0x2b   : > { %1373 = dma.hbm_to_vmem [thread:$0]  (!%p1714_p12), %s1948_s7, 128, %s281_s23, [#allocation3]  }
  0x2c   : > { %s1497_s16 = scalar_lea.hbm %s1949_s8, 128 }
  0x2d   : > { %p1498_p13 = scmp.ne.s32.totalorder %s1949_s8, %s1497_s16  ;;  %p1504_p9 = scmp.lt.u32.totalorder %s1497_s16, %s1949_s8 }
  0x2f   : > { %p1500_p6 = pnand %p1498_p13, %p1471_p0 }
  0x31   : > { %p1501_p5 = pneg %p1500_p6 }
  0x33   : > { %p1506_p10 = pnand %p1504_p9, %p1501_p5 }
  0x35   : > { %1509 = shalt.err (!%p1506_p10)
}
  0x36   : > { %s1510_s23 = scalar_lea.vmem %s1718_s25, 128  ;;  %p1518_p4 = scmp.lt.s32.totalorder %s1718_s25, %s1718_s25 }
  0x37   : > { %p1511_p1 = scmp.ne.s32.totalorder %s1718_s25, %s1510_s23  ;;  %p1519_p7 = scmp.lt.s32.totalorder %s1510_s23, %s1510_s23 }
  0x39   : > { %p1513_p2 = pnand %p1511_p1, %p1471_p0  ;;  %p1520_p8 = por %p1519_p7, %p1518_p4 }
  0x3b   : > { %p1514_p3 = pneg %p1513_p2 }
  0x3d   : > { %p1521_p11 = pnand %p1520_p8, %p1514_p3 }
  0x3f   : > { %1524 = shalt.err (!%p1521_p11)
}
  0x40   : > { %1376 = dma.hbm_to_vmem [thread:$0]  (!%p1714_p12), %s1949_s8, 128, %s1718_s25, [#allocation6]  }
  0x41   : > { %p1959_p13 = scmp.ne.s32.totalorder %s1957_s21, 0 }
  0x42   : > { %p1960_p6 = scmp.eq.s32.totalorder (!%p1959_p13), %s1678_s13, 0 }
  0x43   : > { %311 = sbr.rel (%p1959_p13) target bundleno = 2302 (0x8fe), region = 56 }
  0x4a   : > { %1570 = dma.done.wait (%p1960_p6), [#allocation3], 128   ;;  %p1961_p0 = pmov %p1960_p6 }
  0x4c   : > { %1572 = vsyncadd (%p1961_p0), [#allocation3], 4294967168  ;;  %p1962_p5 = pmov %p1961_p0 }
  0x4d   : > { %p1963_p9 = pmov %p1961_p0 }
  0x4e   : > { %1574 = dma.done.wait (%p1962_p5), [#allocation6], 128  }
  0x4f   : > { %1576 = vsyncadd (%p1963_p9), [#allocation6], 4294967168  ;;  %p350_p10 = scmp.lt.s32.totalorder %s1678_s13, 1  ;;  %vm358_vm0 = vcmask 261120   ;;  %v1427_v3 = vld [vmem:[%s1942_s1 + $0x4] ss:$12 sps:$4 sm:$0xff]   ;;  %v580_v42 = vlaneseq }
  0x50   : > { %v1429_v4 = vld [vmem:[%s1942_s1] ss:$12 sps:$4 sm:$0xff]   ;;  %v1599_v5 = vmov 0.0   ;;  %v1430_v6 = vld [vmem:[%s1942_s1 + $0x8] ss:$12 sps:$4 sm:$0xff]   ;;  %v1600_v8 = vmov 0   ;;  %418 = vmatprep.subr.bf16.mxu0 %v1427_v3 }
  0x51   : > { %s351_s26 = scalar_select %p350_p10, %s1678_s13, 1  ;;  %1294 = vmatprep.subr.bf16.mxu1 %v1599_v5  ;;  %v1431_v7 = vld [vmem:[%s1942_s1 + $0x1c] ss:$12 sps:$4 sm:$0xff]   ;;  %450 = vmatprep.mubr.bf16.mxu0 %v1600_v8  ;;  %v1433_v9 = vld [vmem:[%s1942_s1 + $0x18] ss:$12 sps:$4 sm:$0xff]   ;;  %vm1601_vm1 = vmmov 0  }
  0x52   : > { %419 = vmatpush1.bf16.msra.mxu0 %v1429_v4  ;;  %1295 = vmatpush3.bf16.msra.mxu1 %v1430_v6  ;;  %v1434_v10 = vld [vmem:[%s1942_s1 + $0x20] ss:$12 sps:$4 sm:$0xff]   ;;  %vm696_vm2 = vcmask 1043456   ;;  %s1602_s16 = smov 112   ;;  %s1603_s17 = smov 64   ;;  %vm521_vm3 = vcmask 130048  }
  0x53   : > { %s1233_s25 = sshll.u32 %s351_s26, 3  ;;  %420 = vmatprep.subr.bf16.mxu0 %v1431_v7  ;;  %1296 = vmatprep.subr.bf16.mxu1 %v1599_v5  ;;  %v1234_v15 = vld [vmem:[%s1946_s5] ss:$0 sm:$0xff]  ;;  %v501_v20 = vld [vmem:[#allocation5] sm:$0xff]  ;;  %s1604_s22 = smov 96   ;;  %v581_v43 = vshrl.u32 %v580_v42, 7 }
  0x54   : > { %s353_s29 = scalar_lea.vmem %s1941_s0, %s1233_s25  ;;  %1298 = vmatprep.mubr.msk.bf16.mxu1 %vm1601_vm1, %v1599_v5  ;;  %v499_v19 = vld [vmem:[#allocation2] sm:$0xff]  ;;  %s1605_s24 = smov 80   ;;  %v634_v46 = vand.u32 127, %v580_v42  ;;  %vm643_vm5 = vcmask 64512   ;;  %vm1083_vm9 = vcmask 523264  }
  0x55   : > { %v1782_v0 = vld [vmem:[%s353_s29] sm:$0xff]  ;;  %v583_v44 = vadd.s32 16, %v581_v43  ;;  %v582_v45 = vadd.s32 8, %v581_v43  ;;  %v589_v47 = vand.u32 7, %v581_v43  ;;  %v584_v49 = vadd.s32 24, %v581_v43  ;;  %v1438_v43 = vld [vmem:[%s1943_s2 + $0x18] sm:$0xff]  }
  0x56   : > { %v357_v1 = vmul.f32 %v1782_v0, %v1782_v0  ;;  %421 = vmatpush1.bf16.msra.mxu0 %v1433_v9  ;;  %1297 = vmatpush3.bf16.msra.mxu1 %v1434_v10  ;;  %p1964_p1 = scmp.ne.s32.totalorder %s1955_s19, 0  ;;  %s1606_s21 = smov [#allocation7]  }
  0x57   : > { %v603_v48 = vand.u32 7, %v583_v44  ;;  %v596_v50 = vand.u32 7, %v582_v45  ;;  %vm635_vm4 = vcmp.le.s32.totalorder %v634_v46, %v589_v47  ;;  %v610_v53 = vand.u32 7, %v584_v49  ;;  %v1437_v45 = vld [vmem:[%s1943_s2 + $0x10] sm:$0xff]   ;;  %s1529_s29 = sshll.u32 %s1606_s21, 4  ;;  %s1530_s29 = int_to_ptr.vmem [resolvable:$false] %s1529_s29 }
  0x58   : > { %v359_v2 = vsel %vm358_vm0, %v357_v1, 0.0  ;;  %s1531_s14 = scalar_lea.vmem %s1530_s29, 256 }
  0x59   : > { %360 = vadd.xlane.f32.xlu0 %v359_v2  ;;  %vm637_vm6 = vcmp.le.s32.totalorder %v634_v46, %v603_v48  ;;  %vm636_vm7 = vcmp.le.s32.totalorder %v634_v46, %v596_v50  ;;  %vm638_vm8 = vcmp.le.s32.totalorder %v634_v46, %v610_v53 }
  0xe6   : > { %v361_v11 = vpop.xlane.xlu0 %360 }
  0xe7   : > { %v363_v12 = vmul.f32 0.03125, %v361_v11 }
  0xe9   : > { %v364_v13 = vadd.f32 1e-06, %v363_v12 }
  0xeb   : > { %1445 = vrsqrt.f32 %v364_v13 }
  0xf5   : > { %v1446_v14 = vpop.eup %1445 }
  0xf6   : > { %v366_v16 = vmul.f32 %v1446_v14, %v1782_v0 }
  0xf8   : > { %v373_v17 = vmul.f32 %v1234_v15, %v366_v16 }
  0xfa   : > { %v374_v18 = vpack.c.bf16 %v373_v17, %v373_v17 }
  0xfc   : > { %1241 = vmatmul.mubr.msk.bf16.vlgmr.msra.gmra.mrb[0].mxu0 %vm358_vm0, %v374_v18  ;;  %1299 = vmatmul.mubr.msk.bf16.vlgmr.msra.gmra.mrb[0].mxu1 %vm358_vm0, %v374_v18 }
 0x1cf   : > { %v452_v21 = vpop.f32.mrb[0].mxu0  ;;  %v493_v22 = vpop.f32.mrb[0].mxu1 }
 0x1d0   : > { %v500_v23 = vmul.f32 %v499_v19, %v452_v21  ;;  %v504_v24 = vpack.c.bf16 %v493_v22, %v493_v22  ;;  %v454_v25 = vpop.f32.mrb[1].mxu0  ;;  %v1300_v26 = vpop.f32.mrb[1].mxu1 }
 0x1d1   : > { %v502_v27 = vmul.f32 %v501_v20, %v454_v25  ;;  %v456_v28 = vpop.f32.mrb[2].mxu0  ;;  %v496_v29 = vpop.f32.mrb[2].mxu1 }
 0x1d2   : > { %v698_v30 = vsel %vm696_vm2, %v504_v24, 0  ;;  %v457_v31 = vpop.f32.mrb[3].mxu0  ;;  %v1301_v32 = vpop.f32.mrb[3].mxu1  ;;  %1359 = vmatprep.subr.msk.bf16.mxu1 %vm696_vm2, %v504_v24 }
 0x1d3   : > { %v503_v33 = vadd.f32 %v502_v27, %v500_v23  ;;  %1309 = vmatpush3.bf16.msra.mxu1 %v698_v30 }
 0x1d4   : > { %1320 = vmatprep.subr.bf16.mxu1 %v1599_v5 }
 0x1d5   : > { %506 = vrot.lane.b32.xlu1 %v503_v33, %s1602_s16  ;;  %v517_v34 = vpack.c.bf16 %v503_v33, %v503_v33 }
 0x1d7   : > { %519 = vrot.lane.b32.xlu0 %v517_v34, %s1603_s17 }
 0x1d9   : > { %509 = vrot.lane.b32.xlu1 %v503_v33, %s1604_s22  ;;  %s347_s22 = sand.u32 1, %s1587_s10  }
 0x1dd   : > { %512 = vrot.lane.b32.xlu1 %v503_v33, %s1605_s24  ;;  %s1266_s24 = sshll.u32 %s1678_s13, 7  ;;  %s1130_s13 = scalar_lea.sflag [#allocation4], %s347_s22 }
 0x1de   : > { %s1898_s25 = scalar_lea.hbm %s1950_s9, %s1266_s24 }
 0x247   : > { %v507_v35 = vpop.permute.xlu1 %506 }
 0x248   : > { %v515_v36 = vpack.c.bf16 %v507_v35, %v503_v33 }
 0x249   : > { %v520_v37 = vpop.permute.xlu0 %519 }
 0x24a   : > { %v529_v38 = vsel %vm521_vm3, %v520_v37, 0  ;;  %1358 = vmatprep.subr.msk.bf16.mxu0 %vm521_vm3, %v520_v37  ;;  %1304 = vmatprep.mubr.msk.bf16.mxu0 %vm521_vm3, %v515_v36  ;;  %v1435_v36 = vld [vmem:[%s1943_s2 + $0x8] sm:$0xff]   ;;  %v1436_v37 = vld [vmem:[%s1943_s2] sm:$0xff]  }
 0x24b   : > { %v510_v39 = vpop.permute.xlu1 %509  ;;  %1303 = vmatpush3.bf16.xpose.msra.mxu0 %v529_v38 }
 0x24c   : > { %1314 = vmatprep.subr.bf16.mxu0 %v1599_v5 }
 0x24f   : > { %v513_v40 = vpop.permute.xlu1 %512 }
 0x250   : > { %v516_v41 = vpack.c.bf16 %v513_v40, %v510_v39 }
 0x252   : > { %1305 = vmatmul.mubr.msk.bf16.vlgmr.msra.gmra.mrb[4].mxu0 %vm521_vm3, %v516_v41 }
 0x253   : > { %1316 = vmatprep.mubr.msk.bf16.mxu0 %vm1601_vm1, %v1599_v5  ;;  %1315 = vmatpush3.bf16.msra.mxu0 %v1435_v36 }
 0x254   : > { %1326 = vmatprep.subr.bf16.mxu0 %v1599_v5 }
 0x325   : > { %v1306_v51 = vpop.f32.mrb[4].mxu0 }
 0x326   : > { %v565_v52 = vpop.f32.mrb[5].mxu0  ;;  %v641_v58 = vsel %vm637_vm6, %v1306_v51, -1e+30 }
 0x327   : > { %v639_v54 = vsel %vm635_vm4, %v565_v52, -1e+30  ;;  %v1307_v55 = vpop.f32.mrb[6].mxu0  ;;  %v650_v61 = vsel %vm643_vm5, %v641_v58, -inf }
 0x328   : > { %v568_v56 = vpop.f32.mrb[7].mxu0  ;;  %v644_v57 = vsel %vm643_vm5, %v639_v54, -inf  ;;  %v642_v62 = vsel %vm638_vm8, %v1307_v55, -1e+30 }
 0x329   : > { %v640_v59 = vsel %vm636_vm7, %v568_v56, -1e+30  ;;  %645 = vmax.xlane.f32.xlu1 %v644_v57  ;;  %v653_v63 = vsel %vm643_vm5, %v642_v62, -inf }
 0x32a   : > { %v647_v60 = vsel %vm643_vm5, %v640_v59, -inf }
 0x32b   : > { %648 = vmax.xlane.f32.xlu0 %v647_v60 }
 0x32d   : > { %651 = vmax.xlane.f32.xlu1 %v650_v61 }
 0x331   : > { %654 = vmax.xlane.f32.xlu1 %v653_v63 }
 0x3b6   : > { %v646_v1 = vpop.xlane.xlu1 %645 }
 0x3b7   : > { %v656_v2 = vsub.f32 %v639_v54, %v646_v1 }
 0x3b8   : > { %v649_v3 = vpop.xlane.xlu0 %648 }
 0x3b9   : > { %v660_v4 = vmul.f32 1.442695, %v656_v2  ;;  %v657_v6 = vsub.f32 %v640_v59, %v649_v3 }
 0x3ba   : > { %v652_v7 = vpop.xlane.xlu1 %651 }
 0x3bb   : > { %1447 = vpow2.f32 %v660_v4  ;;  %v662_v8 = vmul.f32 1.442695, %v657_v6  ;;  %v658_v9 = vsub.f32 %v641_v58, %v652_v7 }
 0x3bd   : > { %1449 = vpow2.f32 %v662_v8  ;;  %v664_v10 = vmul.f32 1.442695, %v658_v9  ;;  %v1439_v8 = vld [vmem:[%s1944_s3] sm:$0xff]   ;;  %v1440_v9 = vld [vmem:[%s1944_s3 + $0x8] sm:$0xff]  }
 0x3be   : > { %v655_v11 = vpop.xlane.xlu1 %654 }
 0x3bf   : > { %1451 = vpow2.f32 %v664_v10  ;;  %v659_v12 = vsub.f32 %v642_v62, %v655_v11 }
 0x3c1   : > { %v666_v13 = vmul.f32 1.442695, %v659_v12 }
 0x3c3   : > { %1453 = vpow2.f32 %v666_v13  ;;  %v1255_v13 = vld [vmem:[%s1947_s6] ss:$0 sm:$0xff] }
 0x3c5   : > { %v1448_v14 = vpop.eup %1447 }
 0x3c6   : > { %v668_v15 = vsel %vm643_vm5, %v1448_v14, 0.0 }
 0x3c7   : > { %v1450_v16 = vpop.eup %1449  ;;  %669 = vadd.xlane.f32.xlu1 %v668_v15 }
 0x3c8   : > { %v671_v17 = vsel %vm643_vm5, %v1450_v16, 0.0 }
 0x3c9   : > { %v1452_v18 = vpop.eup %1451  ;;  %672 = vadd.xlane.f32.xlu0 %v671_v17  ;;  %v1441_v17 = vld [vmem:[%s1945_s4] sm:$0xff]  }
 0x3ca   : > { %v674_v19 = vsel %vm643_vm5, %v1452_v18, 0.0 }
 0x3cb   : > { %675 = vadd.xlane.f32.xlu1 %v674_v19  ;;  %v1443_v19 = vld [vmem:[%s1945_s4 + $0x10] sm:$0xff]  }
 0x3cd   : > { %v1454_v20 = vpop.eup %1453 }
 0x3ce   : > { %v677_v21 = vsel %vm643_vm5, %v1454_v20, 0.0 }
 0x3cf   : > { %678 = vadd.xlane.f32.xlu0 %v677_v21 }
 0x454   : > { %v670_v22 = vpop.xlane.xlu1 %669 }
 0x455   : > { %1455 = vrcp.f32 %v670_v22 }
 0x456   : > { %v673_v23 = vpop.xlane.xlu0 %672 }
 0x457   : > { %1457 = vrcp.f32 %v673_v23 }
 0x458   : > { %v676_v24 = vpop.xlane.xlu1 %675 }
 0x459   : > { %1459 = vrcp.f32 %v676_v24 }
 0x45c   : > { %v679_v25 = vpop.xlane.xlu0 %678 }
 0x45d   : > { %1461 = vrcp.f32 %v679_v25 }
 0x45f   : > { %v1456_v26 = vpop.eup %1455 }
 0x460   : > { %v684_v28 = vmul.f32 %v1456_v26, %v1448_v14 }
 0x461   : > { %v1458_v27 = vpop.eup %1457 }
 0x462   : > { %v685_v29 = vmul.f32 %v1458_v27, %v1450_v16 }
 0x463   : > { %v1460_v31 = vpop.eup %1459 }
 0x464   : > { %v688_v30 = vpack.c.bf16 %v685_v29, %v684_v28  ;;  %v686_v33 = vmul.f32 %v1460_v31, %v1452_v18  ;;  %v1442_v18 = vld [vmem:[%s1945_s4 + $0x8] sm:$0xff]  }
 0x466   : > { %1310 = vmatprep.mubr.msk.bf16.mxu1 %vm643_vm5, %v688_v30 }
 0x467   : > { %v1462_v32 = vpop.eup %1461 }
 0x468   : > { %v687_v34 = vmul.f32 %v1462_v32, %v1454_v20  ;;  %v1444_v20 = vld [vmem:[%s1945_s4 + $0x18] sm:$0xff]  }
 0x46a   : > { %v689_v35 = vpack.c.bf16 %v687_v34, %v686_v33 }
 0x46c   : > { %1311 = vmatmul.mubr.msk.bf16.vlgmr.msra.gmra.mrb[4].mxu1 %vm643_vm5, %v689_v35 }
 0x46d   : > { %1322 = vmatprep.mubr.msk.bf16.mxu1 %vm1601_vm1, %v1599_v5  ;;  %1321 = vmatpush3.bf16.msra.mxu1 %v1436_v37 }
 0x46e   : > { %1332 = vmatprep.subr.bf16.mxu1 %v1599_v5 }
 0x53f   : > { %v1312_v38 = vpop.f32.mrb[4].mxu1 }
 0x540   : > { %v734_v39 = vpop.f32.mrb[5].mxu1 }
 0x541   : > { %v1313_v40 = vpop.f32.mrb[6].mxu1 }
 0x542   : > { %v750_v41 = vpack.c.bf16 %v1313_v40, %v1312_v38  ;;  %v737_v42 = vpop.f32.mrb[7].mxu1 }
 0x543   : > { %v749_v44 = vpack.c.bf16 %v737_v42, %v734_v39 }
 0x544   : > { %v910_v47 = vrot.slane %v750_v41, 4 }
 0x545   : > { %v756_v46 = vrot.slane %v749_v44, 4  ;;  %1323 = vmatmul.mubr.msk.bf16.vlgmr.msra.gmra.mrb[8].mxu1 %vm521_vm3, %v749_v44 }
 0x546   : > { %1333 = vmatpush3.bf16.msra.mxu1 %v1438_v43  ;;  %1334 = vmatprep.mubr.msk.bf16.mxu1 %vm1601_vm1, %v1599_v5 }
 0x547   : > { %1317 = vmatmul.mubr.msk.bf16.vlgmr.msra.gmra.mrb[8].mxu0 %vm521_vm3, %v756_v46  ;;  %1346 = vmatprep.subr.bf16.mxu1 %v1599_v5 }
 0x548   : > { %1327 = vmatpush3.bf16.msra.mxu0 %v1437_v45  ;;  %1328 = vmatprep.mubr.msk.bf16.mxu0 %vm1601_vm1, %v1599_v5 }
 0x549   : > { %1338 = vmatprep.subr.bf16.mxu0 %v1599_v5 }
 0x54d   : > { %1335 = vmatmul.mubr.msk.bf16.vlgmr.msra.gmra.mrb[12].mxu1 %vm521_vm3, %v910_v47 }
 0x54e   : > { %1354 = vmatprep.mubr.msk.bf16.mxu1 %vm1601_vm1, %v1599_v5  ;;  %1347 = vmatpush3.bf16.msra.mxu1 %v1441_v17 }
 0x54f   : > { %1329 = vmatmul.mubr.msk.bf16.vlgmr.msra.gmra.mrb[12].mxu0 %vm521_vm3, %v750_v41  ;;  %1348 = vmatprep.subr.bf16.mxu1 %v1599_v5 }
 0x550   : > { %1342 = vmatprep.mubr.msk.bf16.mxu0 %vm1601_vm1, %v1599_v5  ;;  %1339 = vmatpush3.bf16.msra.mxu0 %v1439_v8 }
 0x551   : > { %1340 = vmatprep.subr.bf16.mxu0 %v1599_v5 }
 0x552   : > { %1349 = vmatpush3.bf16.msra.mxu1 %v1442_v18 }
 0x553   : > { %1350 = vmatprep.subr.bf16.mxu1 %v1599_v5 }
 0x554   : > { %1341 = vmatpush3.bf16.msra.mxu0 %v1440_v9 }
 0x556   : > { %1351 = vmatpush3.bf16.msra.mxu1 %v1443_v19 }
 0x557   : > { %1352 = vmatprep.subr.bf16.mxu1 %v1599_v5 }
 0x55a   : > { %1353 = vmatpush3.bf16.msra.mxu1 %v1444_v20 }
 0x618   : > { %v849_v48 = vpop.f32.mrb[8].mxu1 }
 0x619   : > { %v1324_v49 = vpop.f32.mrb[9].mxu1 }
 0x61a   : > { %v800_v50 = vpop.f32.mrb[8].mxu0  ;;  %v852_v51 = vpop.f32.mrb[10].mxu1 }
 0x61b   : > { %v850_v52 = vadd.f32 %v849_v48, %v800_v50  ;;  %v1318_v53 = vpop.f32.mrb[9].mxu0  ;;  %v1325_v54 = vpop.f32.mrb[11].mxu1 }
 0x61c   : > { %v803_v55 = vpop.f32.mrb[10].mxu0 }
 0x61d   : > { %v1319_v56 = vpop.f32.mrb[11].mxu0 }
 0x620   : > { %v954_v57 = vpop.f32.mrb[12].mxu1 }
 0x621   : > { %v1336_v58 = vpop.f32.mrb[13].mxu1 }
 0x622   : > { %v900_v59 = vpop.f32.mrb[12].mxu0  ;;  %v957_v60 = vpop.f32.mrb[14].mxu1 }
 0x623   : > { %v906_v61 = vadd.f32 %v900_v59, %v850_v52  ;;  %v1330_v62 = vpop.f32.mrb[13].mxu0  ;;  %v1337_v63 = vpop.f32.mrb[15].mxu1 }
 0x624   : > { %v903_v1 = vpop.f32.mrb[14].mxu0 }
 0x625   : > { %v960_v2 = vadd.f32 %v954_v57, %v906_v61  ;;  %v1331_v3 = vpop.f32.mrb[15].mxu0 }
 0x627   : > { %v961_v4 = vadd.f32 %v960_v2, %v1782_v0 }
 0x629   : > { %v963_v6 = vmul.f32 %v961_v4, %v961_v4 }
 0x62b   : > { %v964_v7 = vsel %vm358_vm0, %v963_v6, 0.0 }
 0x62c   : > { %965 = vadd.xlane.f32.xlu1 %v964_v7 }
 0x6b9   : > { %v966_v10 = vpop.xlane.xlu1 %965 }
 0x6ba   : > { %v967_v11 = vmul.f32 0.03125, %v966_v10 }
 0x6bc   : > { %v968_v12 = vadd.f32 1e-06, %v967_v11 }
 0x6be   : > { %1463 = vrsqrt.f32 %v968_v12 }
 0x6c8   : > { %v1464_v0 = vpop.eup %1463 }
 0x6c9   : > { %v970_v14 = vmul.f32 %v1464_v0, %v961_v4 }
 0x6cb   : > { %v977_v15 = vmul.f32 %v1255_v13, %v970_v14 }
 0x6cd   : > { %v978_v16 = vpack.c.bf16 %v977_v15, %v977_v15 }
 0x6cf   : > { %1343 = vmatmul.mubr.msk.bf16.vlgmr.msra.gmra.mrb[16].mxu0 %vm358_vm0, %v978_v16 }
 0x7a2   : > { %v1032_v21 = vpop.f32.mrb[16].mxu0 }
 0x7a3   : > { %1046 = vrot.lane.b32.xlu0 %v1032_v21, %s1603_s17  ;;  %v1344_v22 = vpop.f32.mrb[17].mxu0  ;;  %v1259_v25 = vmul.f32 -1.442695, %v1032_v21  ;;  %s1232_s17 = sshll.u32 %s347_s22, 3 }
 0x7a4   : > { %v1035_v23 = vpop.f32.mrb[18].mxu0  ;;  %s349_s23 = scalar_lea.vmem [#allocation7], %s1232_s17 }
 0x7a5   : > { %v1345_v24 = vpop.f32.mrb[19].mxu0  ;;  %1465 = vpow2.f32 %v1259_v25  ;;  %s1143_s18 = sshll.u32 %s349_s23, 4  ;;  %s1900_s18 = int_to_ptr.vmem [resolvable:$true] %s1143_s18 }
 0x7a6   : > { %s1525_s28 = scalar_lea.vmem %s1900_s18, 128  ;;  %p1532_p4 = scmp.lt.s32.totalorder %s1900_s18, %s1530_s29 }
 0x7a7   : > { %p1526_p12 = scmp.ne.s32.totalorder %s1900_s18, %s1525_s28  ;;  %p1533_p7 = scmp.lt.s32.totalorder %s1531_s14, %s1525_s28 }
 0x7a9   : > { %p1527_p2 = pnand %p1526_p12, %p1964_p1  ;;  %p1534_p8 = por %p1533_p7, %p1532_p4 }
 0x7ab   : > { %p1528_p3 = pneg %p1527_p2 }
 0x7ad   : > { %p1535_p11 = pnand %p1534_p8, %p1528_p3 }
 0x7af   : > { %v1466_v26 = vpop.eup %1465 }
 0x7b0   : > { %v1041_v27 = vadd.f32 1.0, %v1466_v26 }
 0x7b2   : > { %1467 = vrcp.f32 %v1041_v27 }
 0x7bc   : > { %v1468_v28 = vpop.eup %1467 }
 0x7bd   : > { %v1044_v5 = vmul.f32 %v1468_v28, %v1032_v21 }
 0x815   : > { %v1047_v29 = vpop.permute.xlu0 %1046 }
 0x816   : > { %v1049_v30 = vmul.f32 %v1047_v29, %v1044_v5 }
 0x818   : > { %v1050_v31 = vpack.c.bf16 %v1049_v30, %v1049_v30 }
 0x81a   : > { %1355 = vmatmul.mubr.msk.bf16.vlgmr.msra.gmra.mrb[16].mxu1 %vm1083_vm9, %v1050_v31 }
 0x8ed   : > { %v1121_v32 = vpop.f32.mrb[16].mxu1 }
 0x8ee   : > { %v1127_v33 = vadd.f32 %v1121_v32, %v961_v4  ;;  %v1356_v34 = vpop.f32.mrb[17].mxu1 }
 0x8ef   : > { %v1124_v35 = vpop.f32.mrb[18].mxu1 }
 0x8f0   : > { %v1357_v36 = vpop.f32.mrb[19].mxu1  ;;  %1128 = vst.msk [vmem:[%s349_s23] sm:$0xff] %vm358_vm0, %v1127_v33 }
 0x8f1   : > { %1538 = shalt.err (!%p1535_p11)
}
 0x8f2   : > { %s1539_s16 = scalar_lea.hbm %s1898_s25, 128  ;;  %s1543_s24 = scalar_lea.hbm %s1950_s9, 256 }
 0x8f3   : > { %p1540_p13 = scmp.ne.s32.totalorder %s1898_s25, %s1539_s16  ;;  %p1544_p5 = scmp.lt.u32.totalorder %s1898_s25, %s1950_s9 }
 0x8f4   : > { %p1545_p9 = scmp.lt.u32.totalorder %s1543_s24, %s1539_s16  ;;  %p1547_p12 = scmp.lt.u32.totalorder %s1539_s16, %s1898_s25 }
 0x8f5   : > { %p1541_p6 = pnand %p1540_p13, %p1964_p1 }
 0x8f6   : > { %p1546_p10 = por %p1545_p9, %p1544_p5 }
 0x8f7   : > { %p1542_p0 = pneg %p1541_p6 }
 0x8f8   : > { %p1548_p2 = por %p1547_p12, %p1546_p10 }
 0x8fa   : > { %p1549_p3 = pnand %p1548_p2, %p1542_p0 }
 0x8fc   : > { %1552 = shalt.err (!%p1549_p3)
}
 0x8fd   : > { %1368 = dma.vmem_to_hbm [thread:$0]  (%p1964_p1), %s1900_s18, 128, %s1898_s25, %s1130_s13  }
 0x8fe PF: > { %p1385_p4 = scmp.ge.s32.totalorder %s1595_s12, 2  ;;  %s1155_s26 = sand.u32 1, %s1583_s30  }
 0x8ff   : > { %p1965_p7 = scmp.ne.s32.totalorder %s1956_s20, 0  ;;  %s1156_s28 = scalar_lea.sflag [#allocation4], %s1155_s26 }
 0x901   : > { %p1378_p8 = pnand %p1385_p4, %p1965_p7 }
 0x903   : > { %1578 = dma.done.wait (!%p1378_p8), %s1156_s28, 128  }
 0x904   : > { %1580 = vsyncadd (!%p1378_p8), %s1156_s28, 4294967168  ;;  %s1966_s21 = sld [smem:[#allocation11_spill]]  ;;  %p21_p11 = scmp.ge.s32.totalorder %s1682_s15, 4  }
 0x905   : > { %s1967_s30 = smov %s1587_s10  ;;  %s1968_s10 = smov %s1591_s11 }
 0x906   : > { %s1970_s12 = smov %s1682_s15  ;;  %23 = sbr.rel (!%p21_p11) target bundleno = 5 (0x5), region = 100 }
 0x90a   : > { %s1969_s11 = smov %s1966_s21 }
 0x90d   :  { %1161 = vsyncpa [#allocation3], 1 }
 0x90e   :  { %1163 = vsyncpa [#allocation3 + $0x1], 1 }
 0x90f   :  { %1164 = vsyncpa [#allocation6], 1 }
 0x910   :  { %1165 = vsyncpa [#allocation4], 1 }
 0x911   :  { %1167 = vsyncpa [#allocation4 + $0x1], 1 }

</bundles_post_ra>
